<compile_context>
chip_gen: v5e
topology: v5e:2x2
jax: 0.10.0
libtpu: 0.0.40
codegen_flags: <defaults>
</compile_context>

<pallas_src>
import functools

import jax
import jax.numpy as jnp
from jax import lax
from jax.experimental import pallas as pl
from jax.experimental.pallas import tpu as pltpu


def _lstm_classifier_kernel(x_ref, wih_ref, whh_ref, b_ref, wout_ref, bout_ref,
                            out_ref, gates_ref, h_ref, c_ref,
                            *, hidden_p, seq_len, seq_tile, has_tail, unroll):
    """Grid = (batch_blocks, seq_chunks); seq axis innermost and sequential.

    x_ref     : (ts, Bblk, E)   bf16  streamed chunk of the embedded sequence
    wih_ref   : (E, 4Hp)        bf16  resident, gate order [i|f|o|g]
    whh_ref   : (Hp, 4Hp)       bf16  resident, gate order [i|f|o|g]
    b_ref     : (1, 4Hp)        f32   resident (b_ih + b_hh, permuted/padded)
    wout_ref  : (Hp, L)         bf16  resident
    bout_ref  : (1, L)          f32   resident
    out_ref   : (Bblk, L)       f32   written only on the last seq chunk
    gates_ref : (ts*Bblk, 4Hp)  f32   VMEM scratch: hoisted input projection
    h_ref/c_ref: (Bblk, Hp)     f32   VMEM scratch: recurrent state carried across chunks
    """
    s = pl.program_id(1)
    ts, bblk, e = x_ref.shape
    Hp = hidden_p

    @pl.when(s == 0)
    def _init():
        h_ref[...] = jnp.zeros_like(h_ref)
        c_ref[...] = jnp.zeros_like(c_ref)

    # Hoisted input projection: one big MXU matmul per chunk, bias folded in here
    # instead of on the serial per-step path.
    x_chunk = x_ref[...].reshape(ts * bblk, e)
    gates_ref[...] = (
        jnp.dot(x_chunk, wih_ref[...], preferred_element_type=jnp.float32) + b_ref[...]
    )

    whh = whh_ref[...]
    mm_dtype = whh.dtype
    chunk_t0 = s * seq_tile  # global timestep of the first row in this chunk

    def step(t, carry):
        h, c = carry
        row = pl.multiple_of(t * bblk, bblk)
        pre = gates_ref[pl.ds(row, bblk), :]                              # (Bblk, 4Hp) f32
        gates = pre + jnp.dot(h.astype(mm_dtype), whh,
                              preferred_element_type=jnp.float32)         # (Bblk, 4Hp) f32
        # Gate layout [ i | f | o | g ], each Hp lanes (vreg-aligned slices).
        # sigmoid(x) == 0.5 * (1 + tanh(0.5*x)) exactly -> one EUP push per vreg.
        ifo = 0.5 * (1.0 + jnp.tanh(0.5 * gates[:, 0:3 * Hp]))
        g_g = jnp.tanh(gates[:, 3 * Hp:4 * Hp])
        i_g = ifo[:, 0 * Hp:1 * Hp]
        f_g = ifo[:, 1 * Hp:2 * Hp]
        o_g = ifo[:, 2 * Hp:3 * Hp]
        c_new = f_g * c + i_g * g_g
        h_new = o_g * jnp.tanh(c_new)
        if has_tail:
            # Padded (zero-input) timesteps must leave the carry EXACTLY unchanged
            # (zero inputs still drive the state through the bias otherwise).
            valid = ((chunk_t0 + t) < seq_len).astype(jnp.float32)
            h_new = valid * h_new + (1.0 - valid) * h
            c_new = valid * c_new + (1.0 - valid) * c
        return h_new, c_new

    h, c = lax.fori_loop(0, ts, step, (h_ref[...], c_ref[...]), unroll=unroll)
    h_ref[...] = h
    c_ref[...] = c

    @pl.when(s == pl.num_programs(1) - 1)
    def _finalize():
        # hidden2label + log_softmax(dim=1); padded hidden columns of W_out are zero.
        y = (jnp.dot(h.astype(mm_dtype), wout_ref[...],
                     preferred_element_type=jnp.float32) + bout_ref[...])
        m = jnp.max(y, axis=-1, keepdims=True)
        lse = jnp.log(jnp.sum(jnp.exp(y - m), axis=-1, keepdims=True)) + m
        out_ref[...] = y - lse


def _pad_axis(a, axis, new_size):
    pad = [(0, 0)] * a.ndim
    pad[axis] = (0, new_size - a.shape[axis])
    return jnp.pad(a, pad)


def _permute_pad_gates(w, hidden, hidden_p, axis=0):
    """Split PyTorch gate blocks [i, f, g, o] along `axis`, zero-pad each block from
    `hidden` to `hidden_p`, and re-concatenate in kernel gate order [i, f, o, g]."""
    def block(k):
        return lax.slice_in_dim(w, k * hidden, (k + 1) * hidden, axis=axis)
    i_b, f_b, g_b, o_b = block(0), block(1), block(2), block(3)
    blocks = [_pad_axis(b, axis, hidden_p) for b in (i_b, f_b, o_b, g_b)]
    return jnp.concatenate(blocks, axis=axis)


def lstm_classifier_forward(sentence, params, *, seq_tile=None, batch_tile=None,
                            compute_dtype=jnp.bfloat16):
    """sentence: (seq_len, batch) int32 token ids.  Returns (batch, label) log-probs."""
    emb_table = params["embedding"]                    # (V, E)
    w_ih, w_hh = params["w_ih"], params["w_hh"]        # (4H, E), (4H, H)
    b_ih, b_hh = params["b_ih"], params["b_hh"]        # (4H,), (4H,)
    w_out, b_out = params["w_out"], params["b_out"]    # (L, H), (L,)

    seq_len, batch = sentence.shape
    embed = emb_table.shape[1]
    hidden = w_hh.shape[1]
    label = w_out.shape[0]
    hidden_p = -(-hidden // 128) * 128                 # lane-aligned per-gate block

    # Embedding gather directly in the streamed compute dtype: no f32 (S,B,E) HBM
    # intermediate that would then be re-read and cast.
    x = emb_table.astype(compute_dtype)[sentence]      # (S, B, E) bf16

    # Batch padded to a full f32 sublane tile (8); padded rows are sliced off outside.
    b_pad = -(-batch // 8) * 8
    # NOTE: on v7x set batch_tile = b_pad // 2 (multiple of 8) for batch >= 16 so the
    # "parallel" batch axis shards across both TensorCores; on v5e/v6e keep one block.
    bblk = b_pad if batch_tile is None else batch_tile
    assert b_pad % bblk == 0 and bblk % 8 == 0, (b_pad, bblk)
    n_bat = b_pad // bblk

    # Sequence-chunk size: target ts*Bblk >= 256 matmul rows for the hoisted projection,
    # capped by the sequence length and the gates-scratch budget.  Any S works via a
    # zero-padded, carry-masked tail.
    if seq_tile is None:
        ts = max(1, 256 // bblk)
        ts = min(ts, seq_len)
        gate_row_bytes = bblk * 4 * hidden_p * 4
        ts = max(1, min(ts, (4 * 1024 * 1024) // gate_row_bytes))
    else:
        ts = int(seq_tile)
    s_pad = -(-seq_len // ts) * ts
    n_seq = s_pad // ts
    has_tail = (s_pad != seq_len)

    if s_pad != seq_len or b_pad != batch:
        x = jnp.pad(x, ((0, s_pad - seq_len), (0, b_pad - batch), (0, 0)))

    # Weight prep: gate blocks permuted [i,f,g,o] -> [i,f,o,g] and zero-padded to Hp.
    wih_p = _permute_pad_gates(w_ih, hidden, hidden_p, axis=0)                     # (4Hp, E)
    whh_p = _permute_pad_gates(_pad_axis(w_hh, 1, hidden_p), hidden, hidden_p, 0)  # (4Hp, Hp)
    bias_p = _permute_pad_gates(b_ih + b_hh, hidden, hidden_p, axis=0)             # (4Hp,)
    wout_p = _pad_axis(w_out, 1, hidden_p)                                         # (L, Hp)

    wih_t = jnp.transpose(wih_p).astype(compute_dtype)        # (E, 4Hp)
    whh_t = jnp.transpose(whh_p).astype(compute_dtype)        # (Hp, 4Hp)
    bias = bias_p.astype(jnp.float32)[None, :]                 # (1, 4Hp) f32
    wout_t = jnp.transpose(wout_p).astype(compute_dtype)       # (Hp, L)
    bout = b_out.astype(jnp.float32)[None, :]                  # (1, L)   f32

    # Bound unrolling when the gate tile is wide to keep the recurrence in registers.
    unroll = True if 4 * hidden_p <= 2048 else 2

    kernel = functools.partial(
        _lstm_classifier_kernel, hidden_p=hidden_p, seq_len=seq_len,
        seq_tile=ts, has_tail=has_tail, unroll=unroll)

    # VMEM budget: 2x the estimated working set, floor 16 MiB, cap 48 MiB (v7x-safe).
    bf, f4 = 2, 4
    est = (2 * ts * bblk * embed * bf                                   # x double-buffer
           + 2 * (embed * 4 * hidden_p * bf + hidden_p * 4 * hidden_p * bf
                  + 4 * hidden_p * f4 + hidden_p * label * bf + label * f4)
           + ts * bblk * 4 * hidden_p * f4                              # gates scratch
           + 2 * bblk * hidden_p * f4                                   # h, c
           + 2 * bblk * label * f4)                                     # out
    vmem_limit = int(min(48 * 1024 * 1024, max(16 * 1024 * 1024, 2 * est)))

    grid_spec = pltpu.PrefetchScalarGridSpec(
        num_scalar_prefetch=0,
        grid=(n_bat, n_seq),
        in_specs=[
            pl.BlockSpec((ts, bblk, embed), lambda b, s: (s, b, 0)),     # streamed x chunks
            pl.BlockSpec((embed, 4 * hidden_p), lambda b, s: (0, 0)),    # resident weights
            pl.BlockSpec((hidden_p, 4 * hidden_p), lambda b, s: (0, 0)),
            pl.BlockSpec((1, 4 * hidden_p), lambda b, s: (0, 0)),
            pl.BlockSpec((hidden_p, label), lambda b, s: (0, 0)),
            pl.BlockSpec((1, label), lambda b, s: (0, 0)),
        ],
        out_specs=pl.BlockSpec((bblk, label), lambda b, s: (b, 0)),
        scratch_shapes=[
            pltpu.VMEM((ts * bblk, 4 * hidden_p), jnp.float32),   # hoisted gate pre-activations
            pltpu.VMEM((bblk, hidden_p), jnp.float32),            # h carry
            pltpu.VMEM((bblk, hidden_p), jnp.float32),            # c carry
        ],
    )

    out = pl.pallas_call(
        kernel,
        out_shape=jax.ShapeDtypeStruct((b_pad, label), jnp.float32),
        grid_spec=grid_spec,
        compiler_params=pltpu.CompilerParams(
            dimension_semantics=("parallel", "arbitrary"),
            vmem_limit_bytes=vmem_limit,
        ),
    )(x, wih_t, whh_t, bias, wout_t, bout)
    return out[:batch]


def _reference_forward(sentence, params):
    """Pure-JAX f32 reference matching the PyTorch module semantics."""
    x = params["embedding"][sentence].astype(jnp.float32)       # (S, B, E)
    _, B, _ = x.shape
    H = params["w_hh"].shape[1]
    wih_t = params["w_ih"].T.astype(jnp.float32)
    whh_t = params["w_hh"].T.astype(jnp.float32)
    bias = (params["b_ih"] + params["b_hh"]).astype(jnp.float32)

    def step(carry, x_t):
        h, c = carry
        g = x_t @ wih_t + h @ whh_t + bias
        i = jax.nn.sigmoid(g[:, 0 * H:1 * H])
        f = jax.nn.sigmoid(g[:, 1 * H:2 * H])
        gg = jnp.tanh(g[:, 2 * H:3 * H])
        o = jax.nn.sigmoid(g[:, 3 * H:4 * H])
        c = f * c + i * gg
        h = o * jnp.tanh(c)
        return (h, c), None

    (h, _), _ = lax.scan(step, (jnp.zeros((B, H), jnp.float32),
                                jnp.zeros((B, H), jnp.float32)), x)
    y = h @ params["w_out"].T.astype(jnp.float32) + params["b_out"].astype(jnp.float32)
    return jax.nn.log_softmax(y, axis=-1)


def init_params(key, vocab_size, embedding_dim, hidden_dim, label_size):
    """Deterministic synthetic parameters with the same shapes as the PyTorch module."""
    ks = jax.random.split(key, 7)
    s = 1.0 / jnp.sqrt(hidden_dim)
    return {
        "embedding": jax.random.normal(ks[0], (vocab_size, embedding_dim), jnp.float32),
        "w_ih": jax.random.uniform(ks[1], (4 * hidden_dim, embedding_dim), jnp.float32, -s, s),
        "w_hh": jax.random.uniform(ks[2], (4 * hidden_dim, hidden_dim), jnp.float32, -s, s),
        "b_ih": jax.random.uniform(ks[3], (4 * hidden_dim,), jnp.float32, -s, s),
        "b_hh": jax.random.uniform(ks[4], (4 * hidden_dim,), jnp.float32, -s, s),
        "w_out": jax.random.uniform(ks[5], (label_size, hidden_dim), jnp.float32, -s, s),
        "b_out": jax.random.uniform(ks[6], (label_size,), jnp.float32, -s, s),
    }


if __name__ == "__main__":
    # Small shapes consistent with the module's forward.
    vocab_size = 50
    embedding_dim = 16
    hidden_dim = 32
    label_size = 4
    batch_size = 2
    seq_len = 8

    key = jax.random.PRNGKey(0)
    k_params, k_sent = jax.random.split(key)
    params = init_params(k_params, vocab_size, embedding_dim, hidden_dim, label_size)
    sentence = jax.random.randint(k_sent, (seq_len, batch_size), 0, vocab_size, dtype=jnp.int32)

    # 1) Evenly-divided sequence: seq_tile=4 -> 2 chunks; exercises the streamed grid
    #    and the h/c VMEM carry across chunks.
    log_probs = lstm_classifier_forward(sentence, params, seq_tile=4)
    jax.block_until_ready(log_probs)
    assert log_probs.shape == (batch_size, label_size), log_probs.shape
    row_sums = jnp.sum(jnp.exp(log_probs), axis=-1)
    assert jnp.allclose(row_sums, 1.0, atol=1e-4), row_sums
    ref = _reference_forward(sentence, params)
    assert jnp.max(jnp.abs(log_probs - ref)) < 0.1, (log_probs, ref)

    # 2) Ragged sequence (S=7, seq_tile=4): exercises the zero-padded, carry-masked tail.
    sentence7 = sentence[:7]
    log_probs7 = lstm_classifier_forward(sentence7, params, seq_tile=4)
    jax.block_until_ready(log_probs7)
    ref7 = _reference_forward(sentence7, params)
    assert jnp.max(jnp.abs(log_probs7 - ref7)) < 0.1, (log_probs7, ref7)

    print("KERNEL_OK")
</pallas_src>

<mosaic_0001>
module attributes {stable_mosaic.version = 11 : i64} {
  func.func @_lstm_classifier_kernel(%arg0: i32, %arg1: i32, %arg2: memref<4x8x16xbf16, #tpu.memory_space<vmem>>, %arg3: memref<16x512xbf16, #tpu.memory_space<vmem>>, %arg4: memref<128x512xbf16, #tpu.memory_space<vmem>>, %arg5: memref<1x512xf32, #tpu.memory_space<vmem>>, %arg6: memref<128x4xbf16, #tpu.memory_space<vmem>>, %arg7: memref<1x4xf32, #tpu.memory_space<vmem>>, %arg8: memref<8x4xf32, #tpu.memory_space<vmem>>, %arg9: memref<32x512xf32, #tpu.memory_space<vmem>>, %arg10: memref<8x128xf32, #tpu.memory_space<vmem>>, %arg11: memref<8x128xf32, #tpu.memory_space<vmem>>) attributes {dimension_semantics = [#tpu.dimension_semantics<parallel>, #tpu.dimension_semantics<arbitrary>], iteration_bounds = array<i64: 1, 2>, scalar_prefetch = 0 : i64, scratch_operands = 3 : i64, tpu.core_type = #tpu.core_type<tc>, window_params = [{transform_indices = @transform_0, window_bounds = array<i64: 4, 8, 16>}, {pipeline_mode = #tpu.pipeline_mode<synchronous>, transform_indices = @transform_1, window_bounds = array<i64: 16, 512>}, {pipeline_mode = #tpu.pipeline_mode<synchronous>, transform_indices = @transform_2, window_bounds = array<i64: 128, 512>}, {pipeline_mode = #tpu.pipeline_mode<synchronous>, transform_indices = @transform_3, window_bounds = array<i64: 1, 512>}, {pipeline_mode = #tpu.pipeline_mode<synchronous>, transform_indices = @transform_4, window_bounds = array<i64: 128, 4>}, {pipeline_mode = #tpu.pipeline_mode<synchronous>, transform_indices = @transform_5, window_bounds = array<i64: 1, 4>}, {transform_indices = @transform_6, window_bounds = array<i64: 8, 4>}]} {
    %c0_i32 = arith.constant 0 : i32
    %0 = arith.cmpi eq, %arg1, %c0_i32 : i32
    %1 = arith.extui %0 : i1 to i32
    %c0_i32_0 = arith.constant 0 : i32
    %2 = arith.cmpi ne, %1, %c0_i32_0 : i32
    scf.if %2 {
      %cst_45 = arith.constant 0.000000e+00 : f32
      %119 = vector.broadcast %cst_45 : f32 to vector<8x128xf32>
      %c0_46 = arith.constant 0 : index
      %c0_47 = arith.constant 0 : index
      %120 = vector.load %arg10[%c0_46, %c0_47] : memref<8x128xf32, #tpu.memory_space<vmem>>, vector<8x128xf32>
      tpu.vector_store %arg10[%c0_46, %c0_47], %119 {strides = array<i32>} : memref<8x128xf32, #tpu.memory_space<vmem>>, vector<8x128xf32>,
      %cst_48 = arith.constant 0.000000e+00 : f32
      %121 = vector.broadcast %cst_48 : f32 to vector<8x128xf32>
      %c0_49 = arith.constant 0 : index
      %c0_50 = arith.constant 0 : index
      %122 = vector.load %arg11[%c0_49, %c0_50] : memref<8x128xf32, #tpu.memory_space<vmem>>, vector<8x128xf32>
      tpu.vector_store %arg11[%c0_49, %c0_50], %121 {strides = array<i32>} : memref<8x128xf32, #tpu.memory_space<vmem>>, vector<8x128xf32>,
    } else {
    }
    %c0 = arith.constant 0 : index
    %c0_1 = arith.constant 0 : index
    %c0_2 = arith.constant 0 : index
    %3 = vector.load %arg2[%c0, %c0_1, %c0_2] : memref<4x8x16xbf16, #tpu.memory_space<vmem>>, vector<4x8x16xbf16>
    %4 = vector.shape_cast %3 : vector<4x8x16xbf16> to vector<32x16xbf16>
    %c0_3 = arith.constant 0 : index
    %c0_4 = arith.constant 0 : index
    %5 = vector.load %arg3[%c0_3, %c0_4] : memref<16x512xbf16, #tpu.memory_space<vmem>>, vector<16x512xbf16>
    %cst = arith.constant dense<0.000000e+00> : vector<32x512xf32>
    %6 = tpu.matmul %4, %5, %cst {dimension_numbers = #tpu.dot_dimension_numbers<[1], [0], [0], [1], [0, 0, 1, 1], [], []>} : vector<32x16xbf16>, vector<16x512xbf16>, vector<32x512xf32> -> vector<32x512xf32>
    %c0_5 = arith.constant 0 : index
    %c0_6 = arith.constant 0 : index
    %7 = vector.load %arg5[%c0_5, %c0_6] : memref<1x512xf32, #tpu.memory_space<vmem>>, vector<1x512xf32>
    %8 = vector.broadcast %7 : vector<1x512xf32> to vector<32x512xf32>
    %9 = arith.addf %6, %8 : vector<32x512xf32>
    %c0_7 = arith.constant 0 : index
    %c0_8 = arith.constant 0 : index
    %10 = vector.load %arg9[%c0_7, %c0_8] : memref<32x512xf32, #tpu.memory_space<vmem>>, vector<32x512xf32>
    tpu.vector_store %arg9[%c0_7, %c0_8], %9 {strides = array<i32>} : memref<32x512xf32, #tpu.memory_space<vmem>>, vector<32x512xf32>,
    %c0_9 = arith.constant 0 : index
    %c0_10 = arith.constant 0 : index
    %11 = vector.load %arg4[%c0_9, %c0_10] : memref<128x512xbf16, #tpu.memory_space<vmem>>, vector<128x512xbf16>
    %c0_11 = arith.constant 0 : index
    %c0_12 = arith.constant 0 : index
    %12 = vector.load %arg10[%c0_11, %c0_12] : memref<8x128xf32, #tpu.memory_space<vmem>>, vector<8x128xf32>
    %c0_13 = arith.constant 0 : index
    %c0_14 = arith.constant 0 : index
    %13 = vector.load %arg11[%c0_13, %c0_14] : memref<8x128xf32, #tpu.memory_space<vmem>>, vector<8x128xf32>
    %c0_i32_15 = arith.constant 0 : i32
    %c8_i32 = arith.constant 8 : i32
    %14 = arith.muli %c0_i32_15, %c8_i32 : i32
    %15 = tpu.assume_multiple %14, 8 : i32
    %16 = arith.index_cast %15 : i32 to index
    %c0_16 = arith.constant 0 : index
    %17 = vector.load %arg9[%16, %c0_16] : memref<32x512xf32, #tpu.memory_space<vmem>>, vector<8x512xf32>
    %18 = arith.truncf %12 : vector<8x128xf32> to vector<8x128xbf16>
    %cst_17 = arith.constant dense<0.000000e+00> : vector<8x512xf32>
    %19 = tpu.matmul %18, %11, %cst_17 {dimension_numbers = #tpu.dot_dimension_numbers<[1], [0], [0], [1], [0, 0, 1, 1], [], []>} : vector<8x128xbf16>, vector<128x512xbf16>, vector<8x512xf32> -> vector<8x512xf32>
    %20 = arith.addf %17, %19 : vector<8x512xf32>
    %21 = vector.extract_strided_slice %20 {offsets = [0, 0], sizes = [8, 384], strides = [1, 1]} : vector<8x512xf32> to vector<8x384xf32>
    %cst_18 = arith.constant 5.000000e-01 : f32
    %22 = vector.broadcast %cst_18 : f32 to vector<8x384xf32>
    %23 = arith.mulf %22, %21 : vector<8x384xf32>
    %24 = math.tanh %23 : vector<8x384xf32>
    %cst_19 = arith.constant 1.000000e+00 : f32
    %25 = vector.broadcast %cst_19 : f32 to vector<8x384xf32>
    %26 = arith.addf %25, %24 : vector<8x384xf32>
    %cst_20 = arith.constant 5.000000e-01 : f32
    %27 = vector.broadcast %cst_20 : f32 to vector<8x384xf32>
    %28 = arith.mulf %27, %26 : vector<8x384xf32>
    %29 = vector.extract_strided_slice %20 {offsets = [0, 384], sizes = [8, 128], strides = [1, 1]} : vector<8x512xf32> to vector<8x128xf32>
    %30 = math.tanh %29 : vector<8x128xf32>
    %31 = vector.extract_strided_slice %28 {offsets = [0, 0], sizes = [8, 128], strides = [1, 1]} : vector<8x384xf32> to vector<8x128xf32>
    %32 = vector.extract_strided_slice %28 {offsets = [0, 128], sizes = [8, 128], strides = [1, 1]} : vector<8x384xf32> to vector<8x128xf32>
    %33 = vector.extract_strided_slice %28 {offsets = [0, 256], sizes = [8, 128], strides = [1, 1]} : vector<8x384xf32> to vector<8x128xf32>
    %34 = arith.mulf %32, %13 : vector<8x128xf32>
    %35 = arith.mulf %31, %30 : vector<8x128xf32>
    %36 = arith.addf %34, %35 : vector<8x128xf32>
    %37 = math.tanh %36 : vector<8x128xf32>
    %38 = arith.mulf %33, %37 : vector<8x128xf32>
    %c1_i32 = arith.constant 1 : i32
    %c8_i32_21 = arith.constant 8 : i32
    %39 = arith.muli %c1_i32, %c8_i32_21 : i32
    %40 = tpu.assume_multiple %39, 8 : i32
    %41 = arith.index_cast %40 : i32 to index
    %c0_22 = arith.constant 0 : index
    %42 = vector.load %arg9[%41, %c0_22] : memref<32x512xf32, #tpu.memory_space<vmem>>, vector<8x512xf32>
    %43 = arith.truncf %38 : vector<8x128xf32> to vector<8x128xbf16>
    %cst_23 = arith.constant dense<0.000000e+00> : vector<8x512xf32>
    %44 = tpu.matmul %43, %11, %cst_23 {dimension_numbers = #tpu.dot_dimension_numbers<[1], [0], [0], [1], [0, 0, 1, 1], [], []>} : vector<8x128xbf16>, vector<128x512xbf16>, vector<8x512xf32> -> vector<8x512xf32>
    %45 = arith.addf %42, %44 : vector<8x512xf32>
    %46 = vector.extract_strided_slice %45 {offsets = [0, 0], sizes = [8, 384], strides = [1, 1]} : vector<8x512xf32> to vector<8x384xf32>
    %cst_24 = arith.constant 5.000000e-01 : f32
    %47 = vector.broadcast %cst_24 : f32 to vector<8x384xf32>
    %48 = arith.mulf %47, %46 : vector<8x384xf32>
    %49 = math.tanh %48 : vector<8x384xf32>
    %cst_25 = arith.constant 1.000000e+00 : f32
    %50 = vector.broadcast %cst_25 : f32 to vector<8x384xf32>
    %51 = arith.addf %50, %49 : vector<8x384xf32>
    %cst_26 = arith.constant 5.000000e-01 : f32
    %52 = vector.broadcast %cst_26 : f32 to vector<8x384xf32>
    %53 = arith.mulf %52, %51 : vector<8x384xf32>
    %54 = vector.extract_strided_slice %45 {offsets = [0, 384], sizes = [8, 128], strides = [1, 1]} : vector<8x512xf32> to vector<8x128xf32>
    %55 = math.tanh %54 : vector<8x128xf32>
    %56 = vector.extract_strided_slice %53 {offsets = [0, 0], sizes = [8, 128], strides = [1, 1]} : vector<8x384xf32> to vector<8x128xf32>
    %57 = vector.extract_strided_slice %53 {offsets = [0, 128], sizes = [8, 128], strides = [1, 1]} : vector<8x384xf32> to vector<8x128xf32>
    %58 = vector.extract_strided_slice %53 {offsets = [0, 256], sizes = [8, 128], strides = [1, 1]} : vector<8x384xf32> to vector<8x128xf32>
    %59 = arith.mulf %57, %36 : vector<8x128xf32>
    %60 = arith.mulf %56, %55 : vector<8x128xf32>
    %61 = arith.addf %59, %60 : vector<8x128xf32>
    %62 = math.tanh %61 : vector<8x128xf32>
    %63 = arith.mulf %58, %62 : vector<8x128xf32>
    %c2_i32 = arith.constant 2 : i32
    %c8_i32_27 = arith.constant 8 : i32
    %64 = arith.muli %c2_i32, %c8_i32_27 : i32
    %65 = tpu.assume_multiple %64, 8 : i32
    %66 = arith.index_cast %65 : i32 to index
    %c0_28 = arith.constant 0 : index
    %67 = vector.load %arg9[%66, %c0_28] : memref<32x512xf32, #tpu.memory_space<vmem>>, vector<8x512xf32>
    %68 = arith.truncf %63 : vector<8x128xf32> to vector<8x128xbf16>
    %cst_29 = arith.constant dense<0.000000e+00> : vector<8x512xf32>
    %69 = tpu.matmul %68, %11, %cst_29 {dimension_numbers = #tpu.dot_dimension_numbers<[1], [0], [0], [1], [0, 0, 1, 1], [], []>} : vector<8x128xbf16>, vector<128x512xbf16>, vector<8x512xf32> -> vector<8x512xf32>
    %70 = arith.addf %67, %69 : vector<8x512xf32>
    %71 = vector.extract_strided_slice %70 {offsets = [0, 0], sizes = [8, 384], strides = [1, 1]} : vector<8x512xf32> to vector<8x384xf32>
    %cst_30 = arith.constant 5.000000e-01 : f32
    %72 = vector.broadcast %cst_30 : f32 to vector<8x384xf32>
    %73 = arith.mulf %72, %71 : vector<8x384xf32>
    %74 = math.tanh %73 : vector<8x384xf32>
    %cst_31 = arith.constant 1.000000e+00 : f32
    %75 = vector.broadcast %cst_31 : f32 to vector<8x384xf32>
    %76 = arith.addf %75, %74 : vector<8x384xf32>
    %cst_32 = arith.constant 5.000000e-01 : f32
    %77 = vector.broadcast %cst_32 : f32 to vector<8x384xf32>
    %78 = arith.mulf %77, %76 : vector<8x384xf32>
    %79 = vector.extract_strided_slice %70 {offsets = [0, 384], sizes = [8, 128], strides = [1, 1]} : vector<8x512xf32> to vector<8x128xf32>
    %80 = math.tanh %79 : vector<8x128xf32>
    %81 = vector.extract_strided_slice %78 {offsets = [0, 0], sizes = [8, 128], strides = [1, 1]} : vector<8x384xf32> to vector<8x128xf32>
    %82 = vector.extract_strided_slice %78 {offsets = [0, 128], sizes = [8, 128], strides = [1, 1]} : vector<8x384xf32> to vector<8x128xf32>
    %83 = vector.extract_strided_slice %78 {offsets = [0, 256], sizes = [8, 128], strides = [1, 1]} : vector<8x384xf32> to vector<8x128xf32>
    %84 = arith.mulf %82, %61 : vector<8x128xf32>
    %85 = arith.mulf %81, %80 : vector<8x128xf32>
    %86 = arith.addf %84, %85 : vector<8x128xf32>
    %87 = math.tanh %86 : vector<8x128xf32>
    %88 = arith.mulf %83, %87 : vector<8x128xf32>
    %c3_i32 = arith.constant 3 : i32
    %c8_i32_33 = arith.constant 8 : i32
    %89 = arith.muli %c3_i32, %c8_i32_33 : i32
    %90 = tpu.assume_multiple %89, 8 : i32
    %91 = arith.index_cast %90 : i32 to index
    %c0_34 = arith.constant 0 : index
    %92 = vector.load %arg9[%91, %c0_34] : memref<32x512xf32, #tpu.memory_space<vmem>>, vector<8x512xf32>
    %93 = arith.truncf %88 : vector<8x128xf32> to vector<8x128xbf16>
    %cst_35 = arith.constant dense<0.000000e+00> : vector<8x512xf32>
    %94 = tpu.matmul %93, %11, %cst_35 {dimension_numbers = #tpu.dot_dimension_numbers<[1], [0], [0], [1], [0, 0, 1, 1], [], []>} : vector<8x128xbf16>, vector<128x512xbf16>, vector<8x512xf32> -> vector<8x512xf32>
    %95 = arith.addf %92, %94 : vector<8x512xf32>
    %96 = vector.extract_strided_slice %95 {offsets = [0, 0], sizes = [8, 384], strides = [1, 1]} : vector<8x512xf32> to vector<8x384xf32>
    %cst_36 = arith.constant 5.000000e-01 : f32
    %97 = vector.broadcast %cst_36 : f32 to vector<8x384xf32>
    %98 = arith.mulf %97, %96 : vector<8x384xf32>
    %99 = math.tanh %98 : vector<8x384xf32>
    %cst_37 = arith.constant 1.000000e+00 : f32
    %100 = vector.broadcast %cst_37 : f32 to vector<8x384xf32>
    %101 = arith.addf %100, %99 : vector<8x384xf32>
    %cst_38 = arith.constant 5.000000e-01 : f32
    %102 = vector.broadcast %cst_38 : f32 to vector<8x384xf32>
    %103 = arith.mulf %102, %101 : vector<8x384xf32>
    %104 = vector.extract_strided_slice %95 {offsets = [0, 384], sizes = [8, 128], strides = [1, 1]} : vector<8x512xf32> to vector<8x128xf32>
    %105 = math.tanh %104 : vector<8x128xf32>
    %106 = vector.extract_strided_slice %103 {offsets = [0, 0], sizes = [8, 128], strides = [1, 1]} : vector<8x384xf32> to vector<8x128xf32>
    %107 = vector.extract_strided_slice %103 {offsets = [0, 128], sizes = [8, 128], strides = [1, 1]} : vector<8x384xf32> to vector<8x128xf32>
    %108 = vector.extract_strided_slice %103 {offsets = [0, 256], sizes = [8, 128], strides = [1, 1]} : vector<8x384xf32> to vector<8x128xf32>
    %109 = arith.mulf %107, %86 : vector<8x128xf32>
    %110 = arith.mulf %106, %105 : vector<8x128xf32>
    %111 = arith.addf %109, %110 : vector<8x128xf32>
    %112 = math.tanh %111 : vector<8x128xf32>
    %113 = arith.mulf %108, %112 : vector<8x128xf32>
    %c4_i32 = arith.constant 4 : i32
    %c0_39 = arith.constant 0 : index
    %c0_40 = arith.constant 0 : index
    %114 = vector.load %arg10[%c0_39, %c0_40] : memref<8x128xf32, #tpu.memory_space<vmem>>, vector<8x128xf32>
    tpu.vector_store %arg10[%c0_39, %c0_40], %113 {strides = array<i32>} : memref<8x128xf32, #tpu.memory_space<vmem>>, vector<8x128xf32>,
    %c0_41 = arith.constant 0 : index
    %c0_42 = arith.constant 0 : index
    %115 = vector.load %arg11[%c0_41, %c0_42] : memref<8x128xf32, #tpu.memory_space<vmem>>, vector<8x128xf32>
    tpu.vector_store %arg11[%c0_41, %c0_42], %111 {strides = array<i32>} : memref<8x128xf32, #tpu.memory_space<vmem>>, vector<8x128xf32>,
    %c1_i32_43 = arith.constant 1 : i32
    %116 = arith.cmpi eq, %arg1, %c1_i32_43 : i32
    %117 = arith.extui %116 : i1 to i32
    %c0_i32_44 = arith.constant 0 : i32
    %118 = arith.cmpi ne, %117, %c0_i32_44 : i32
    scf.if %118 {
      %119 = arith.truncf %113 : vector<8x128xf32> to vector<8x128xbf16>
      %c0_45 = arith.constant 0 : index
      %c0_46 = arith.constant 0 : index
      %120 = vector.load %arg6[%c0_45, %c0_46] : memref<128x4xbf16, #tpu.memory_space<vmem>>, vector<128x4xbf16>
      %cst_47 = arith.constant dense<0.000000e+00> : vector<8x4xf32>
      %121 = tpu.matmul %119, %120, %cst_47 {dimension_numbers = #tpu.dot_dimension_numbers<[1], [0], [0], [1], [0, 0, 1, 1], [], []>} : vector<8x128xbf16>, vector<128x4xbf16>, vector<8x4xf32> -> vector<8x4xf32>
      %c0_48 = arith.constant 0 : index
      %c0_49 = arith.constant 0 : index
      %122 = vector.load %arg7[%c0_48, %c0_49] : memref<1x4xf32, #tpu.memory_space<vmem>>, vector<1x4xf32>
      %123 = vector.broadcast %122 : vector<1x4xf32> to vector<8x4xf32>
      %124 = arith.addf %121, %123 : vector<8x4xf32>
      %cst_50 = arith.constant dense<0xFF800000> : vector<8xf32>
      %125 = vector.multi_reduction <maximumf>, %124, %cst_50 [1] : vector<8x4xf32> to vector<8xf32>
      %126 = vector.shape_cast %125 : vector<8xf32> to vector<8x1xf32>
      %127 = vector.broadcast %126 : vector<8x1xf32> to vector<8x4xf32>
      %128 = arith.subf %124, %127 : vector<8x4xf32>
      %129 = math.exp %128 : vector<8x4xf32>
      %cst_51 = arith.constant dense<0.000000e+00> : vector<8xf32>
      %130 = vector.multi_reduction <add>, %129, %cst_51 [1] : vector<8x4xf32> to vector<8xf32>
      %131 = vector.shape_cast %130 : vector<8xf32> to vector<8x1xf32>
      %132 = math.log %131 : vector<8x1xf32>
      %133 = arith.addf %132, %126 : vector<8x1xf32>
      %134 = vector.broadcast %133 : vector<8x1xf32> to vector<8x4xf32>
      %135 = arith.subf %124, %134 : vector<8x4xf32>
      %c0_52 = arith.constant 0 : index
      %c0_53 = arith.constant 0 : index
      %136 = vector.load %arg8[%c0_52, %c0_53] : memref<8x4xf32, #tpu.memory_space<vmem>>, vector<8x4xf32>
      tpu.vector_store %arg8[%c0_52, %c0_53], %135 {strides = array<i32>} : memref<8x4xf32, #tpu.memory_space<vmem>>, vector<8x4xf32>,
    } else {
    }
    return
  }
  func.func @transform_0(%arg0: i32, %arg1: i32) -> (i32, i32, i32) {
    %c0_i32 = arith.constant 0 : i32
    %c0_i32_0 = arith.constant 0 : i32
    return %arg1, %arg0, %c0_i32 : i32, i32, i32
  }
  func.func @transform_1(%arg0: i32, %arg1: i32) -> (i32, i32) {
    %c0_i32 = arith.constant 0 : i32
    %c0_i32_0 = arith.constant 0 : i32
    %c0_i32_1 = arith.constant 0 : i32
    return %c0_i32, %c0_i32_0 : i32, i32
  }
  func.func @transform_2(%arg0: i32, %arg1: i32) -> (i32, i32) {
    %c0_i32 = arith.constant 0 : i32
    %c0_i32_0 = arith.constant 0 : i32
    %c0_i32_1 = arith.constant 0 : i32
    return %c0_i32, %c0_i32_0 : i32, i32
  }
  func.func @transform_3(%arg0: i32, %arg1: i32) -> (i32, i32) {
    %c0_i32 = arith.constant 0 : i32
    %c0_i32_0 = arith.constant 0 : i32
    %c0_i32_1 = arith.constant 0 : i32
    return %c0_i32, %c0_i32_0 : i32, i32
  }
  func.func @transform_4(%arg0: i32, %arg1: i32) -> (i32, i32) {
    %c0_i32 = arith.constant 0 : i32
    %c0_i32_0 = arith.constant 0 : i32
    %c0_i32_1 = arith.constant 0 : i32
    return %c0_i32, %c0_i32_0 : i32, i32
  }
  func.func @transform_5(%arg0: i32, %arg1: i32) -> (i32, i32) {
    %c0_i32 = arith.constant 0 : i32
    %c0_i32_0 = arith.constant 0 : i32
    %c0_i32_1 = arith.constant 0 : i32
    return %c0_i32, %c0_i32_0 : i32, i32
  }
  func.func @transform_6(%arg0: i32, %arg1: i32) -> (i32, i32) {
    %c0_i32 = arith.constant 0 : i32
    %c0_i32_0 = arith.constant 0 : i32
    return %arg0, %c0_i32 : i32, i32
  }
}

</mosaic_0001>

<bundles_post_ra>
// kernel: tpu_custom_call.1
= control target key start
LH: loop header
LB: loop body
LE: loop exit
PB: predicated region body
PF: predicated region fallthrough
CT: control target
= control target key end

     0   :  { %11 = vsyncpa [#allocation6], 0  ;;  %s2016_s0 = inlined_call_operand.vmem [shape: bf16[8,8,16], index: 0, kind: input, shape index: {}]   ;;  %s2017_s1 = inlined_call_operand.vmem [shape: bf16[16,512], index: 1, kind: input, shape index: {}]   ;;  %s2018_s2 = inlined_call_operand.hbm [shape: bf16[128,512], index: 2, kind: input, shape index: {}]   ;;  %s2019_s3 = inlined_call_operand.hbm [shape: f32[1,512], index: 3, kind: input, shape index: {}]   ;;  %s2020_s4 = inlined_call_operand.vmem [shape: bf16[128,4], index: 4, kind: input, shape index: {}]   ;;  %s2021_s5 = inlined_call_operand.vmem [shape: f32[1,4], index: 5, kind: input, shape index: {}]   ;;  %s2022_s6 = inlined_call_operand.vmem [shape: f32[8,4], index: 6, kind: output, shape index: {}]  }
   0x1   :  { %12 = vsyncpa [#allocation8], 0  ;;  %s1651_s21 = smov 0   ;;  %s1653_s22 = smov 0  }
   0x2   :  { %s1655_s23 = smov 0  }
   0x3 LB: > { %s1173_s24 = sadd.s32 4294967295, %s1609_s23   ;;  %s27_s25 = sadd.s32 1, %s1605_s22  ;;  %s1609_s23 = sphi %s1655_s23, %s18_s23   ;;  %s1605_s22 = sphi %s1653_s22, %s2034_s22   ;;  %s1601_s21 = sphi %s1651_s21, %s2033_s21  }
   0x4   : > { %p28_p0 = scmp.ge.s32.totalorder %s27_s25, 2  ;;  %p1174_p1 = scmp.ge.s32.totalorder %s1609_s23, 1 }
   0x5   : > { %p194_p2 = scmp.lt.s32.totalorder %s1609_s23, 3  ;;  %p1676_p4 = scmp.eq.s32.totalorder %s1173_s24, 0 }
   0x6   : > { %s2036_s25 = smov (%p28_p0, %s27_s25), 0  ;;  %s208_s30 = sshll.u32 %s2018_s2, 4  ;;  %s209_s30 = int_to_ptr.hbm [resolvable:$true] %s208_s30 }
   0x7   : > { %p1672_p3 = pnand %p1174_p1, %p194_p2  ;;  %s1611_s7 = smov [#allocation5]  }
   0x8   : > { %s210_s8 = sshll.u32 %s1611_s7, 4  ;;  %s223_s11 = sshll.u32 %s2019_s3, 4  ;;  %s211_s8 = int_to_ptr.vmem [resolvable:$true] %s210_s8  ;;  %s224_s11 = int_to_ptr.hbm [resolvable:$true] %s223_s11 }
   0x9   : > { %p1434_p5 = pneg %p1672_p3  ;;  %s1612_s12 = smov 256  }
   0xa   : > { %s1613_s13 = smov 16   ;;  %s1614_s14 = smov [#allocation7]  }
   0xb   : > { %p1435_p6 = pnand %p1676_p4, %p1434_p5  ;;  %s225_s15 = sshll.u32 %s1614_s14, 4  ;;  %s226_s15 = int_to_ptr.vmem [resolvable:$true] %s225_s15 }
   0xc   : > { %256 = sbr.rel (%p1672_p3) target bundleno = 1116 (0x45c), region = 44 }
   0xd   : > { %1437 = dma.hbm_to_vmem [thread:$0]  (!%p1435_p6), %s209_s30, 4096, %s211_s8, [#allocation6], %s1612_s12, %s1612_s12, %s1613_s13  }
   0xe   : > { %1440 = dma.hbm_to_vmem [thread:$0]  (!%p1435_p6), %s224_s11, 64, %s226_s15, [#allocation8]  }
  0x11   : > { %1592 = dma.done.wait (%p1676_p4), [#allocation6], 4096  }
  0x12   : > { %1594 = vsyncadd (%p1676_p4), [#allocation6], 4294963200 }
  0x13   : > { %1596 = dma.done.wait (%p1676_p4), [#allocation8], 64  }
  0x14   : > { %1598 = vsyncadd (%p1676_p4), [#allocation8], 4294967232  ;;  %s1181_s16 = sshll.u32 %s1601_s21, 2  ;;  %p1183_p8 = scmp.ne.s32.totalorder %s1601_s21, 0 }
  0x15   : > { %p295_p7 = scmp.lt.s32.totalorder %s1181_s16, 7 }
  0x16   : > { %311 = sbr.rel (%p1183_p8) target bundleno = 30 (0x1e), region = 56 }
  0x17   : > { %s2038_s16 = smov (!%p295_p7, %s1181_s16), 7 }
  0x18   : > { %s1182_s17 = sshll.u32 %s2038_s16, 2 }
  0x19   : > { %s1704_s20 = scalar_lea.vmem %s2016_s0, %s1182_s17 }
  0x1b   : > { %v1615_v0 = vmov 0.0  }
  0x1c   : > { %312 = vst [vmem:[#allocation3] sm:$0xff] %v1615_v0 }
  0x1d   : > { %313 = vst [vmem:[#allocation4] sm:$0xff] %v1615_v0 }
  0x1e PF: > { %v1194_v1 = vld [vmem:[%s2017_s1] sm:$0xf]  ;;  %v1384_v2 = vld [vmem:[%s2017_s1 + $0xc] sm:$0xf0]  ;;  %v1382_v3 = vld [vmem:[%s2017_s1 + $0x4] sm:$0xf] }
  0x1f   : > { %v1195_v4 = vor.u32 %v1384_v2, %v1194_v1  ;;  %v1196_v5 = vld [vmem:[%s2017_s1 + $0x10] sm:$0xf0]  ;;  %v1202_v6 = vld [vmem:[%s2017_s1 + $0x8] sm:$0xf]  ;;  %v1385_v7 = vld [vmem:[%s2017_s1 + $0x14] sm:$0xf0] }
  0x20   : > { %v1199_v8 = vor.u32 %v1382_v3, %v1196_v5  ;;  %v1203_v9 = vor.u32 %v1385_v7, %v1202_v6  ;;  %v1383_v10 = vld [vmem:[%s2017_s1 + $0xc] sm:$0xf]  ;;  %v1204_v11 = vld [vmem:[%s2017_s1 + $0x18] sm:$0xf0]  ;;  %v1380_v12 = vld [vmem:[%s1704_s20] sm:$0xff]  ;;  %vm362_vm0 = vcmask 130048  }
  0x21   : > { %376 = vmatpush.bf16.msra.mxu0 %v1195_v4  ;;  %v1207_v13 = vor.u32 %v1383_v10, %v1204_v11  ;;  %v1330_v14 = vld [vmem:[#allocation5 + $0xe0] sm:$0xf]  ;;  %v1416_v15 = vld [vmem:[#allocation5 + $0xec] sm:$0xf0]  ;;  %v1414_v16 = vld [vmem:[#allocation5 + $0xe4] sm:$0xf] }
  0x22   : > { %395 = vmatpush.bf16.msra.mxu1 %v1199_v8  ;;  %414 = vmatpush.bf16.msra.mxu2 %v1203_v9  ;;  %v1732_v17 = vor.u32 %v1416_v15, %v1330_v14  ;;  %v1332_v18 = vld [vmem:[#allocation5 + $0xf0] sm:$0xf0]  ;;  %v1415_v19 = vld [vmem:[#allocation5 + $0xec] sm:$0xf]  ;;  %v1340_v20 = vld [vmem:[#allocation5 + $0xf8] sm:$0xf0] }
  0x23   : > { %433 = vmatpush.bf16.msra.mxu3 %v1207_v13  ;;  %v1734_v21 = vor.u32 %v1414_v16, %v1332_v18  ;;  %v1736_v22 = vor.u32 %v1415_v19, %v1340_v20  ;;  %v1338_v23 = vld [vmem:[#allocation5 + $0xe8] sm:$0xf]  ;;  %v1417_v24 = vld [vmem:[#allocation5 + $0xf4] sm:$0xf0]  ;;  %v1314_v25 = vld [vmem:[#allocation5 + $0xc0] sm:$0xf] }
  0x24   : > { %1208 = vmatmul.msk.bf16.vlgmr.msra.gmra.mxu0 %vm362_vm0, %v1380_v12  ;;  %v1739_v26 = vor.u32 %v1417_v24, %v1338_v23  ;;  %v1412_v27 = vld [vmem:[#allocation5 + $0xcc] sm:$0xf0]  ;;  %v1410_v28 = vld [vmem:[#allocation5 + $0xc4] sm:$0xf]  ;;  %v1316_v29 = vld [vmem:[#allocation5 + $0xd0] sm:$0xf0] }
  0x25   : > { %1210 = vmatmul.msk.bf16.vlgmr.msra.gmra.mxu1 %vm362_vm0, %v1380_v12  ;;  %1212 = vmatmul.msk.bf16.vlgmr.msra.gmra.mxu2 %vm362_vm0, %v1380_v12  ;;  %v1411_v30 = vld [vmem:[#allocation5 + $0xcc] sm:$0xf]  ;;  %v1324_v31 = vld [vmem:[#allocation5 + $0xd8] sm:$0xf0]  ;;  %v1322_v32 = vld [vmem:[#allocation5 + $0xc8] sm:$0xf]  ;;  %v1745_v33 = vor.u32 %v1412_v27, %v1314_v25  ;;  %v1749_v35 = vor.u32 %v1410_v28, %v1316_v29 }
  0x26   : > { %1214 = vmatmul.msk.bf16.vlgmr.msra.gmra.mxu3 %vm362_vm0, %v1380_v12  ;;  %663 = vmatpush.bf16.msrb.mxu0 %v1732_v17  ;;  %v1413_v34 = vld [vmem:[#allocation5 + $0xd4] sm:$0xf0]  ;;  %v1751_v36 = vor.u32 %v1411_v30, %v1324_v31  ;;  %v1298_v37 = vld [vmem:[#allocation5 + $0xa0] sm:$0xf]  ;;  %v1408_v38 = vld [vmem:[#allocation5 + $0xac] sm:$0xf0] }
  0x27   : > { %676 = vmatpush.bf16.msrb.mxu1 %v1734_v21  ;;  %702 = vmatpush.bf16.msrb.mxu3 %v1736_v22  ;;  %v1406_v39 = vld [vmem:[#allocation5 + $0xa4] sm:$0xf]  ;;  %v1754_v40 = vor.u32 %v1413_v34, %v1322_v32  ;;  %v1300_v41 = vld [vmem:[#allocation5 + $0xb0] sm:$0xf0]  ;;  %v1407_v42 = vld [vmem:[#allocation5 + $0xac] sm:$0xf]  ;;  %v1757_v46 = vor.u32 %v1408_v38, %v1298_v37 }
  0x28   : > { %689 = vmatpush.bf16.msrb.mxu2 %v1739_v26  ;;  %v1308_v43 = vld [vmem:[#allocation5 + $0xb8] sm:$0xf0]  ;;  %v1306_v44 = vld [vmem:[#allocation5 + $0xa8] sm:$0xf]  ;;  %v1409_v45 = vld [vmem:[#allocation5 + $0xb4] sm:$0xf0]  ;;  %v1761_v47 = vor.u32 %v1406_v39, %v1300_v41 }
  0x29   : > { %v1763_v48 = vor.u32 %v1407_v42, %v1308_v43  ;;  %v1282_v49 = vld [vmem:[#allocation5 + $0x80] sm:$0xf]  ;;  %v1404_v50 = vld [vmem:[#allocation5 + $0x8c] sm:$0xf0]  ;;  %v1402_v51 = vld [vmem:[#allocation5 + $0x84] sm:$0xf]  ;;  %v1766_v52 = vor.u32 %v1409_v45, %v1306_v44 }
  0x2a   : > { %664 = vmatpush.bf16.msrb.mxu0 %v1745_v33  ;;  %v1284_v53 = vld [vmem:[#allocation5 + $0x90] sm:$0xf0]  ;;  %v1403_v54 = vld [vmem:[#allocation5 + $0x8c] sm:$0xf]  ;;  %v1292_v55 = vld [vmem:[#allocation5 + $0x98] sm:$0xf0]  ;;  %v1769_v58 = vor.u32 %v1404_v50, %v1282_v49 }
  0x2b   : > { %677 = vmatpush.bf16.msrb.mxu1 %v1749_v35  ;;  %703 = vmatpush.bf16.msrb.mxu3 %v1751_v36  ;;  %v1290_v56 = vld [vmem:[#allocation5 + $0x88] sm:$0xf]  ;;  %v1405_v57 = vld [vmem:[#allocation5 + $0x94] sm:$0xf0]  ;;  %v1774_v60 = vor.u32 %v1402_v51, %v1284_v53  ;;  %v1776_v61 = vor.u32 %v1403_v54, %v1292_v55  ;;  %v1266_v62 = vld [vmem:[#allocation5 + $0x60] sm:$0xf] }
  0x2c   : > { %690 = vmatpush.bf16.msrb.mxu2 %v1754_v40  ;;  %v1381_v59 = vld [vmem:[%s1704_s20 + $0x8] sm:$0xff]  ;;  %v1400_v63 = vld [vmem:[#allocation5 + $0x6c] sm:$0xf0]  ;;  %v1398_v0 = vld [vmem:[#allocation5 + $0x64] sm:$0xf]  ;;  %v1779_v1 = vor.u32 %v1405_v57, %v1290_v56  ;;  %p1344_p9 = scmp.ne.s32.totalorder %s1601_s21, 1 }
  0x2d   : > { %v1268_v2 = vld [vmem:[#allocation5 + $0x70] sm:$0xf0]  ;;  %v1399_v3 = vld [vmem:[#allocation5 + $0x6c] sm:$0xf]  ;;  %v1276_v4 = vld [vmem:[#allocation5 + $0x78] sm:$0xf0]  ;;  %v1782_v7 = vor.u32 %v1400_v63, %v1266_v62 }
  0x2e   : > { %665 = vmatpush.bf16.msrb.mxu0 %v1757_v46  ;;  %v1274_v5 = vld [vmem:[#allocation5 + $0x68] sm:$0xf]  ;;  %v1401_v6 = vld [vmem:[#allocation5 + $0x74] sm:$0xf0]  ;;  %v1786_v8 = vor.u32 %v1398_v0, %v1268_v2  ;;  %v1788_v9 = vor.u32 %v1399_v3, %v1276_v4  ;;  %v1250_v10 = vld [vmem:[#allocation5 + $0x40] sm:$0xf] }
  0x2f   : > { %678 = vmatpush.bf16.msrb.mxu1 %v1761_v47  ;;  %704 = vmatpush.bf16.msrb.mxu3 %v1763_v48  ;;  %v1396_v11 = vld [vmem:[#allocation5 + $0x4c] sm:$0xf0]  ;;  %v1394_v12 = vld [vmem:[#allocation5 + $0x44] sm:$0xf]  ;;  %v1792_v13 = vor.u32 %v1401_v6, %v1274_v5  ;;  %v1252_v14 = vld [vmem:[#allocation5 + $0x50] sm:$0xf0] }
  0x30   : > { %691 = vmatpush.bf16.msrb.mxu2 %v1766_v52  ;;  %v1395_v15 = vld [vmem:[#allocation5 + $0x4c] sm:$0xf]  ;;  %v1260_v16 = vld [vmem:[#allocation5 + $0x58] sm:$0xf0]  ;;  %v1258_v18 = vld [vmem:[#allocation5 + $0x48] sm:$0xf]  ;;  %v1798_v20 = vor.u32 %v1396_v11, %v1250_v10  ;;  %v1802_v23 = vor.u32 %v1394_v12, %v1252_v14 }
  0x31   : > { %v1397_v19 = vld [vmem:[#allocation5 + $0x54] sm:$0xf0]  ;;  %v1804_v24 = vor.u32 %v1395_v15, %v1260_v16  ;;  %v1234_v25 = vld [vmem:[#allocation5 + $0x20] sm:$0xf]  ;;  %v1392_v27 = vld [vmem:[#allocation5 + $0x2c] sm:$0xf0] }
  0x32   : > { %666 = vmatpush.bf16.msrb.mxu0 %v1769_v58  ;;  %v1390_v28 = vld [vmem:[#allocation5 + $0x24] sm:$0xf]  ;;  %v1807_v29 = vor.u32 %v1397_v19, %v1258_v18  ;;  %v1236_v30 = vld [vmem:[#allocation5 + $0x30] sm:$0xf0]  ;;  %v1391_v31 = vld [vmem:[#allocation5 + $0x2c] sm:$0xf]  ;;  %v1810_v38 = vor.u32 %v1392_v27, %v1234_v25 }
  0x33   : > { %679 = vmatpush.bf16.msrb.mxu1 %v1774_v60  ;;  %705 = vmatpush.bf16.msrb.mxu3 %v1776_v61  ;;  %v1244_v32 = vld [vmem:[#allocation5 + $0x38] sm:$0xf0]  ;;  %v1242_v34 = vld [vmem:[#allocation5 + $0x28] sm:$0xf]  ;;  %v1393_v37 = vld [vmem:[#allocation5 + $0x34] sm:$0xf0]  ;;  %v1814_v39 = vor.u32 %v1390_v28, %v1236_v30 }
  0x34   : > { %692 = vmatpush.bf16.msrb.mxu2 %v1779_v1  ;;  %1209 = vmatmul.msk.bf16.gmra.mxu0 %vm362_vm0, %v1381_v59  ;;  %v1816_v41 = vor.u32 %v1391_v31, %v1244_v32  ;;  %v1218_v42 = vld [vmem:[#allocation5] sm:$0xf]  ;;  %v1388_v43 = vld [vmem:[#allocation5 + $0xc] sm:$0xf0]  ;;  %v1386_v44 = vld [vmem:[#allocation5 + $0x4] sm:$0xf]  ;;  %v1819_v45 = vor.u32 %v1393_v37, %v1242_v34 }
  0x35   : > { %1211 = vmatmul.msk.bf16.gmra.mxu1 %vm362_vm0, %v1381_v59  ;;  %1213 = vmatmul.msk.bf16.gmra.mxu2 %vm362_vm0, %v1381_v59  ;;  %v1220_v49 = vld [vmem:[#allocation5 + $0x10] sm:$0xf0]  ;;  %v1387_v50 = vld [vmem:[#allocation5 + $0xc] sm:$0xf]  ;;  %v1228_v51 = vld [vmem:[#allocation5 + $0x18] sm:$0xf0]  ;;  %v1822_v55 = vor.u32 %v1388_v43, %v1218_v42 }
  0x36   : > { %1215 = vmatmul.msk.bf16.gmra.mxu3 %vm362_vm0, %v1381_v59  ;;  %667 = vmatpush.bf16.msrb.mxu0 %v1782_v7  ;;  %v1226_v53 = vld [vmem:[#allocation5 + $0x8] sm:$0xf]  ;;  %v1389_v54 = vld [vmem:[#allocation5 + $0x14] sm:$0xf0]  ;;  %v493_v56 = vld [vmem:[#allocation3] sm:$0xff]  ;;  %v1826_v57 = vor.u32 %v1386_v44, %v1220_v49  ;;  %v1828_v59 = vor.u32 %v1387_v50, %v1228_v51 }
  0x37   : > { %680 = vmatpush.bf16.msrb.mxu1 %v1786_v8  ;;  %706 = vmatpush.bf16.msrb.mxu3 %v1788_v9  ;;  %v1831_v62 = vor.u32 %v1389_v54, %v1226_v53  ;;  %v502_v63 = vpack.c.bf16 %v493_v56, %v493_v56  ;;  %v322_v3 = vld [vmem:[#allocation7] sm:$0xf] }
  0x38   : > { %693 = vmatpush.bf16.msrb.mxu2 %v1792_v13  ;;  %v324_v4 = vperm.slane %v322_v3, 0  ;;  %v325_v6 = vperm.slane %v322_v3, 1  ;;  %v326_v16 = vperm.slane %v322_v3, 2  ;;  %v327_v18 = vperm.slane %v322_v3, 3 }
  0x3a   : > { %668 = vmatpush.bf16.msrb.mxu0 %v1798_v20 }
  0x3b   : > { %681 = vmatpush.bf16.msrb.mxu1 %v1802_v23  ;;  %707 = vmatpush.bf16.msrb.mxu3 %v1804_v24 }
  0x3c   : > { %694 = vmatpush.bf16.msrb.mxu2 %v1807_v29 }
  0x3e   : > { %669 = vmatpush.bf16.msrb.mxu0 %v1810_v38 }
  0x3f   : > { %682 = vmatpush.bf16.msrb.mxu1 %v1814_v39  ;;  %708 = vmatpush.bf16.msrb.mxu3 %v1816_v41 }
  0x40   : > { %695 = vmatpush.bf16.msrb.mxu2 %v1819_v45 }
  0x42   : > { %670 = vmatpush.bf16.msrb.mxu0 %v1822_v55 }
  0x43   : > { %683 = vmatpush.bf16.msrb.mxu1 %v1826_v57  ;;  %709 = vmatpush.bf16.msrb.mxu3 %v1828_v59 }
  0x44   : > { %696 = vmatpush.bf16.msrb.mxu2 %v1831_v62 }
  0x45   : > { %671 = vmatmul.bf16.vlgmr.msrb.gmra.mxu0 %v502_v63 }
  0x46   : > { %745 = vmatpush.bf16.msra.mxu0 %v1732_v17  ;;  %684 = vmatmul.bf16.vlgmr.msrb.gmra.mxu1 %v502_v63 }
  0x47   : > { %758 = vmatpush.bf16.msra.mxu1 %v1734_v21  ;;  %710 = vmatmul.bf16.vlgmr.msrb.gmra.mxu3 %v502_v63 }
  0x48   : > { %697 = vmatmul.bf16.vlgmr.msrb.gmra.mxu2 %v502_v63  ;;  %784 = vmatpush.bf16.msra.mxu3 %v1736_v22 }
  0x49   : > { %771 = vmatpush.bf16.msra.mxu2 %v1739_v26 }
  0x4a   : > { %746 = vmatpush.bf16.msra.mxu0 %v1745_v33 }
  0x4b   : > { %759 = vmatpush.bf16.msra.mxu1 %v1749_v35 }
  0x4c   : > { %785 = vmatpush.bf16.msra.mxu3 %v1751_v36 }
  0x4d   : > { %772 = vmatpush.bf16.msra.mxu2 %v1754_v40 }
  0x4e   : > { %747 = vmatpush.bf16.msra.mxu0 %v1757_v46 }
  0x4f   : > { %760 = vmatpush.bf16.msra.mxu1 %v1761_v47 }
  0x50   : > { %786 = vmatpush.bf16.msra.mxu3 %v1763_v48 }
  0x51   : > { %773 = vmatpush.bf16.msra.mxu2 %v1766_v52 }
  0x52   : > { %748 = vmatpush.bf16.msra.mxu0 %v1769_v58 }
  0x53   : > { %761 = vmatpush.bf16.msra.mxu1 %v1774_v60 }
  0x54   : > { %787 = vmatpush.bf16.msra.mxu3 %v1776_v61 }
  0x55   : > { %774 = vmatpush.bf16.msra.mxu2 %v1779_v1 }
  0x56   : > { %749 = vmatpush.bf16.msra.mxu0 %v1782_v7 }
  0x57   : > { %762 = vmatpush.bf16.msra.mxu1 %v1786_v8 }
  0x58   : > { %788 = vmatpush.bf16.msra.mxu3 %v1788_v9 }
  0x59   : > { %775 = vmatpush.bf16.msra.mxu2 %v1792_v13 }
  0x5a   : > { %750 = vmatpush.bf16.msra.mxu0 %v1798_v20 }
  0x5b   : > { %763 = vmatpush.bf16.msra.mxu1 %v1802_v23 }
  0x5c   : > { %789 = vmatpush.bf16.msra.mxu3 %v1804_v24 }
  0x5d   : > { %776 = vmatpush.bf16.msra.mxu2 %v1807_v29 }
  0x5e   : > { %751 = vmatpush.bf16.msra.mxu0 %v1810_v38 }
  0x5f   : > { %764 = vmatpush.bf16.msra.mxu1 %v1814_v39 }
  0x60   : > { %790 = vmatpush.bf16.msra.mxu3 %v1816_v41 }
  0x61   : > { %777 = vmatpush.bf16.msra.mxu2 %v1819_v45 }
  0x62   : > { %752 = vmatpush.bf16.msra.mxu0 %v1822_v55 }
  0x63   : > { %765 = vmatpush.bf16.msra.mxu1 %v1826_v57 }
  0x64   : > { %791 = vmatpush.bf16.msra.mxu3 %v1828_v59 }
  0x65   : > { %778 = vmatpush.bf16.msra.mxu2 %v1831_v62 }
  0x66   : > { %827 = vmatpush.bf16.msrb.mxu0 %v1732_v17 }
  0x67   : > { %840 = vmatpush.bf16.msrb.mxu1 %v1734_v21 }
  0x68   : > { %866 = vmatpush.bf16.msrb.mxu3 %v1736_v22 }
  0x69   : > { %853 = vmatpush.bf16.msrb.mxu2 %v1739_v26 }
  0x6a   : > { %828 = vmatpush.bf16.msrb.mxu0 %v1745_v33 }
  0x6b   : > { %841 = vmatpush.bf16.msrb.mxu1 %v1749_v35 }
  0x6c   : > { %867 = vmatpush.bf16.msrb.mxu3 %v1751_v36 }
  0x6d   : > { %854 = vmatpush.bf16.msrb.mxu2 %v1754_v40 }
  0x6e   : > { %829 = vmatpush.bf16.msrb.mxu0 %v1757_v46 }
  0x6f   : > { %842 = vmatpush.bf16.msrb.mxu1 %v1761_v47 }
  0x70   : > { %868 = vmatpush.bf16.msrb.mxu3 %v1763_v48 }
  0x71   : > { %855 = vmatpush.bf16.msrb.mxu2 %v1766_v52 }
  0x72   : > { %830 = vmatpush.bf16.msrb.mxu0 %v1769_v58 }
  0x73   : > { %843 = vmatpush.bf16.msrb.mxu1 %v1774_v60 }
  0x74   : > { %869 = vmatpush.bf16.msrb.mxu3 %v1776_v61 }
  0x75   : > { %856 = vmatpush.bf16.msrb.mxu2 %v1779_v1 }
  0x76   : > { %831 = vmatpush.bf16.msrb.mxu0 %v1782_v7 }
  0x77   : > { %844 = vmatpush.bf16.msrb.mxu1 %v1786_v8 }
  0x78   : > { %870 = vmatpush.bf16.msrb.mxu3 %v1788_v9 }
  0x79   : > { %857 = vmatpush.bf16.msrb.mxu2 %v1792_v13 }
  0x7a   : > { %832 = vmatpush.bf16.msrb.mxu0 %v1798_v20 }
  0x7b   : > { %845 = vmatpush.bf16.msrb.mxu1 %v1802_v23 }
  0x7c   : > { %871 = vmatpush.bf16.msrb.mxu3 %v1804_v24 }
  0x7d   : > { %858 = vmatpush.bf16.msrb.mxu2 %v1807_v29 }
  0x7e   : > { %833 = vmatpush.bf16.msrb.mxu0 %v1810_v38 }
  0x7f   : > { %846 = vmatpush.bf16.msrb.mxu1 %v1814_v39 }
  0x80   : > { %872 = vmatpush.bf16.msrb.mxu3 %v1816_v41 }
  0x81   : > { %859 = vmatpush.bf16.msrb.mxu2 %v1819_v45 }
  0x82   : > { %834 = vmatpush.bf16.msrb.mxu0 %v1822_v55 }
  0x83   : > { %847 = vmatpush.bf16.msrb.mxu1 %v1826_v57 }
  0x84   : > { %873 = vmatpush.bf16.msrb.mxu3 %v1828_v59 }
  0x85   : > { %860 = vmatpush.bf16.msrb.mxu2 %v1831_v62 }
  0xa1   : > { %v378_v0 = vpop.f32.mrf.mxu0 }
  0xa2   : > { %v397_v2 = vpop.f32.mrf.mxu1  ;;  %v379_v56 = vadd.f32 %v378_v0, %v324_v4 }
  0xa8   : > { %v416_v5 = vpop.f32.mrf.mxu2 }
  0xa9   : > { %v435_v10 = vpop.f32.mrf.mxu3  ;;  %v380_v11 = vpop.f32.mrf.mxu0 }
  0xaa   : > { %v1901_v12 = vadd.f32 %v380_v11, %v324_v4  ;;  %v399_v14 = vpop.f32.mrf.mxu1  ;;  %v398_v11 = vadd.f32 %v397_v2, %v325_v6 }
  0xab   : > { %v1903_v15 = vadd.f32 %v399_v14, %v325_v6 }
  0xb0   : > { %v418_v19 = vpop.f32.mrf.mxu2 }
  0xb1   : > { %v1905_v25 = vadd.f32 %v418_v19, %v326_v16  ;;  %v437_v27 = vpop.f32.mrf.mxu3  ;;  %v383_v28 = vpop.f32.mrf.mxu0 }
  0xb2   : > { %v1907_v30 = vadd.f32 %v437_v27, %v327_v18  ;;  %v1909_v31 = vadd.f32 %v383_v28, %v324_v4  ;;  %v402_v32 = vpop.f32.mrf.mxu1 }
  0xb3   : > { %v1911_v34 = vadd.f32 %v402_v32, %v325_v6 }
  0xb8   : > { %v421_v37 = vpop.f32.mrf.mxu2 }
  0xb9   : > { %v1913_v42 = vadd.f32 %v421_v37, %v326_v16  ;;  %v440_v43 = vpop.f32.mrf.mxu3  ;;  %v385_v44 = vpop.f32.mrf.mxu0 }
  0xba   : > { %v1915_v49 = vadd.f32 %v440_v43, %v327_v18  ;;  %v1917_v50 = vadd.f32 %v385_v44, %v324_v4  ;;  %v404_v51 = vpop.f32.mrf.mxu1  ;;  %v436_v44 = vadd.f32 %v435_v10, %v327_v18 }
  0xbb   : > { %v1919_v53 = vadd.f32 %v404_v51, %v325_v6 }
  0xbc   : > { %2025 = vst [vmem:[#allocation11_spill] sm:$0xff] %v1915_v49 }
  0xbd   : > { %2026 = vst [vmem:[#allocation12_spill] sm:$0xff] %v1917_v50  ;;  %v417_v50 = vadd.f32 %v416_v5, %v326_v16 }
  0xbe   : > { %2027 = vst [vmem:[#allocation13_spill] sm:$0xff] %v1919_v53 }
  0xc0   : > { %v423_v54 = vpop.f32.mrf.mxu2 }
  0xc1   : > { %v1921_v63 = vadd.f32 %v423_v54, %v326_v16  ;;  %v442_v3 = vpop.f32.mrf.mxu3 }
  0xc2   : > { %v1923_v14 = vadd.f32 %v442_v3, %v327_v18  ;;  %v672_v19 = vpop.f32.mrf.mxu0 }
  0xc3   : > { %v715_v27 = vadd.f32 %v672_v19, %v379_v56  ;;  %v685_v28 = vpop.f32.mrf.mxu1  ;;  %v494_v19 = vld [vmem:[#allocation4] sm:$0xff] }
  0xc4   : > { %2028 = vst [vmem:[#allocation14_spill] sm:$0xff] %v1923_v14  ;;  %v716_v32 = vadd.f32 %v685_v28, %v398_v11 }
  0xc5   : > { %v719_v37 = vmul.f32 0.5, %v715_v27 }
  0xc6   : > { %v720_v43 = vmul.f32 0.5, %v716_v32 }
  0xc7   : > { %1474 = vtanh.f32 %v719_v37 }
  0xc8   : > { %1476 = vtanh.f32 %v720_v43 }
  0xca   : > { %v711_v51 = vpop.f32.mrf.mxu3  ;;  %v674_v0 = vpop.f32.mrf.mxu0 }
  0xcb   : > { %v698_v53 = vpop.f32.mrf.mxu2  ;;  %v718_v49 = vadd.f32 %v711_v51, %v436_v44  ;;  %v687_v54 = vpop.f32.mrf.mxu1 }
  0xcc   : > { %v717_v4 = vadd.f32 %v698_v53, %v417_v50  ;;  %v2029_v54 = vld [vmem:[#allocation11_spill] sm:$0xff] }
  0xcd   : > { %1478 = vtanh.f32 %v718_v49  ;;  %v1475_v2 = vpop.eup %1474 }
  0xce   : > { %v721_v6 = vmul.f32 0.5, %v717_v4  ;;  %v1477_v3 = vpop.eup %1476  ;;  %v725_v14 = vadd.f32 1.0, %v1475_v2 }
  0xcf   : > { %v726_v56 = vadd.f32 1.0, %v1477_v3 }
  0xd0   : > { %1480 = vtanh.f32 %v721_v6  ;;  %v728_v11 = vmul.f32 0.5, %v725_v14 }
  0xd1   : > { %v729_v27 = vmul.f32 0.5, %v726_v56 }
  0xd2   : > { %v713_v28 = vpop.f32.mrf.mxu3 }
  0xd3   : > { %v1479_v10 = vpop.eup %1478  ;;  %v700_v18 = vpop.f32.mrf.mxu2  ;;  %v732_v5 = vmul.f32 %v729_v27, %v494_v19 }
  0xd4   : > { %v733_v16 = vmul.f32 %v1479_v10, %v728_v11 }
  0xd6   : > { %v1481_v32 = vpop.eup %1480  ;;  %v1925_v37 = vadd.f32 %v733_v16, %v732_v5 }
  0xd7   : > { %v727_v49 = vadd.f32 1.0, %v1481_v32 }
  0xd8   : > { %1482 = vtanh.f32 %v1925_v37 }
  0xd9   : > { %v730_v50 = vmul.f32 0.5, %v727_v49 }
  0xde   : > { %v1483_v53 = vpop.eup %1482 }
  0xdf   : > { %v736_v43 = vmul.f32 %v1483_v53, %v730_v50 }
  0xe1   : > { %v744_v44 = vpack.c.bf16 %v736_v43, %v736_v43 }
  0xe3   : > { %753 = vmatmul.bf16.vlgmr.msra.gmra.mxu0 %v744_v44  ;;  %766 = vmatmul.bf16.vlgmr.msra.gmra.mxu1 %v744_v44 }
  0xe4   : > { %779 = vmatmul.bf16.vlgmr.msra.gmra.mxu2 %v744_v44  ;;  %792 = vmatmul.bf16.vlgmr.msra.gmra.mxu3 %v744_v44 }
  0xe5   : > { %909 = vmatpush.bf16.msra.mxu0 %v1732_v17  ;;  %922 = vmatpush.bf16.msra.mxu1 %v1734_v21 }
  0xe6   : > { %935 = vmatpush.bf16.msra.mxu2 %v1739_v26  ;;  %948 = vmatpush.bf16.msra.mxu3 %v1736_v22 }
  0xe9   : > { %910 = vmatpush.bf16.msra.mxu0 %v1745_v33  ;;  %923 = vmatpush.bf16.msra.mxu1 %v1749_v35 }
  0xea   : > { %936 = vmatpush.bf16.msra.mxu2 %v1754_v40  ;;  %949 = vmatpush.bf16.msra.mxu3 %v1751_v36 }
  0xed   : > { %911 = vmatpush.bf16.msra.mxu0 %v1757_v46  ;;  %924 = vmatpush.bf16.msra.mxu1 %v1761_v47 }
  0xee   : > { %937 = vmatpush.bf16.msra.mxu2 %v1766_v52  ;;  %950 = vmatpush.bf16.msra.mxu3 %v1763_v48 }
  0xf1   : > { %912 = vmatpush.bf16.msra.mxu0 %v1769_v58  ;;  %925 = vmatpush.bf16.msra.mxu1 %v1774_v60 }
  0xf2   : > { %938 = vmatpush.bf16.msra.mxu2 %v1779_v1  ;;  %951 = vmatpush.bf16.msra.mxu3 %v1776_v61 }
  0xf5   : > { %913 = vmatpush.bf16.msra.mxu0 %v1782_v7  ;;  %926 = vmatpush.bf16.msra.mxu1 %v1786_v8 }
  0xf6   : > { %939 = vmatpush.bf16.msra.mxu2 %v1792_v13  ;;  %952 = vmatpush.bf16.msra.mxu3 %v1788_v9 }
  0xf9   : > { %914 = vmatpush.bf16.msra.mxu0 %v1798_v20  ;;  %927 = vmatpush.bf16.msra.mxu1 %v1802_v23 }
  0xfa   : > { %940 = vmatpush.bf16.msra.mxu2 %v1807_v29  ;;  %953 = vmatpush.bf16.msra.mxu3 %v1804_v24 }
  0xfd   : > { %915 = vmatpush.bf16.msra.mxu0 %v1810_v38  ;;  %928 = vmatpush.bf16.msra.mxu1 %v1814_v39 }
  0xfe   : > { %941 = vmatpush.bf16.msra.mxu2 %v1819_v45  ;;  %954 = vmatpush.bf16.msra.mxu3 %v1816_v41 }
 0x101   : > { %916 = vmatpush.bf16.msra.mxu0 %v1822_v55  ;;  %929 = vmatpush.bf16.msra.mxu1 %v1826_v57 }
 0x102   : > { %942 = vmatpush.bf16.msra.mxu2 %v1831_v62  ;;  %955 = vmatpush.bf16.msra.mxu3 %v1828_v59 }
 0x160   : > { %v754_v17 = vpop.f32.mrf.mxu0  ;;  %v767_v21 = vpop.f32.mrf.mxu1 }
 0x161   : > { %v797_v22 = vadd.f32 %v754_v17, %v1901_v12  ;;  %v798_v26 = vadd.f32 %v767_v21, %v1903_v15 }
 0x163   : > { %v801_v33 = vmul.f32 0.5, %v797_v22  ;;  %v802_v35 = vmul.f32 0.5, %v798_v26  ;;  %v2030_v22 = vld [vmem:[#allocation12_spill] sm:$0xff] }
 0x165   : > { %1484 = vtanh.f32 %v801_v33  ;;  %v2031_v33 = vld [vmem:[#allocation13_spill] sm:$0xff] }
 0x166   : > { %1486 = vtanh.f32 %v802_v35 }
 0x167   : > { %v780_v36 = vpop.f32.mrf.mxu2  ;;  %v793_v40 = vpop.f32.mrf.mxu3 }
 0x168   : > { %v799_v46 = vadd.f32 %v780_v36, %v1905_v25  ;;  %v800_v47 = vadd.f32 %v793_v40, %v1907_v30  ;;  %v756_v48 = vpop.f32.mrf.mxu0  ;;  %v769_v52 = vpop.f32.mrf.mxu1 }
 0x169   : > { %v2032_v52 = vld [vmem:[#allocation14_spill] sm:$0xff] }
 0x16a   : > { %v803_v58 = vmul.f32 0.5, %v799_v46  ;;  %1488 = vtanh.f32 %v800_v47 }
 0x16b   : > { %v1485_v60 = vpop.eup %1484 }
 0x16c   : > { %v1487_v61 = vpop.eup %1486  ;;  %v807_v1 = vadd.f32 1.0, %v1485_v60  ;;  %1490 = vtanh.f32 %v803_v58 }
 0x16d   : > { %v808_v7 = vadd.f32 1.0, %v1487_v61 }
 0x16e   : > { %v810_v8 = vmul.f32 0.5, %v807_v1 }
 0x16f   : > { %v811_v9 = vmul.f32 0.5, %v808_v7  ;;  %v782_v13 = vpop.f32.mrf.mxu2  ;;  %v795_v20 = vpop.f32.mrf.mxu3 }
 0x170   : > { %v1489_v23 = vpop.eup %1488 }
 0x171   : > { %v814_v24 = vmul.f32 %v811_v9, %v1925_v37  ;;  %v815_v29 = vmul.f32 %v1489_v23, %v810_v8 }
 0x172   : > { %v1491_v38 = vpop.eup %1490 }
 0x173   : > { %v816_v39 = vadd.f32 %v815_v29, %v814_v24  ;;  %v809_v41 = vadd.f32 1.0, %v1491_v38 }
 0x175   : > { %1492 = vtanh.f32 %v816_v39  ;;  %v812_v45 = vmul.f32 0.5, %v809_v41 }
 0x17b   : > { %v1493_v55 = vpop.eup %1492 }
 0x17c   : > { %v818_v57 = vmul.f32 %v1493_v55, %v812_v45 }
 0x17e   : > { %v826_v59 = vpack.c.bf16 %v818_v57, %v818_v57 }
 0x180   : > { %835 = vmatmul.bf16.vlgmr.msrb.gmra.mxu0 %v826_v59  ;;  %848 = vmatmul.bf16.vlgmr.msrb.gmra.mxu1 %v826_v59 }
 0x181   : > { %861 = vmatmul.bf16.vlgmr.msrb.gmra.mxu2 %v826_v59  ;;  %874 = vmatmul.bf16.vlgmr.msrb.gmra.mxu3 %v826_v59 }
 0x1fd   : > { %v836_v62 = vpop.f32.mrf.mxu0  ;;  %v849_v12 = vpop.f32.mrf.mxu1 }
 0x1fe   : > { %v879_v15 = vadd.f32 %v836_v62, %v1909_v31  ;;  %v880_v25 = vadd.f32 %v849_v12, %v1911_v34 }
 0x200   : > { %v883_v30 = vmul.f32 0.5, %v879_v15  ;;  %v884_v14 = vmul.f32 0.5, %v880_v25 }
 0x202   : > { %1494 = vtanh.f32 %v883_v30 }
 0x203   : > { %1496 = vtanh.f32 %v884_v14 }
 0x204   : > { %v862_v51 = vpop.f32.mrf.mxu2  ;;  %v875_v0 = vpop.f32.mrf.mxu3 }
 0x205   : > { %v881_v4 = vadd.f32 %v862_v51, %v1913_v42  ;;  %v882_v2 = vadd.f32 %v875_v0, %v2029_v54  ;;  %v838_v6 = vpop.f32.mrf.mxu0  ;;  %v851_v3 = vpop.f32.mrf.mxu1 }
 0x207   : > { %v885_v56 = vmul.f32 0.5, %v881_v4  ;;  %1498 = vtanh.f32 %v882_v2 }
 0x208   : > { %v1495_v11 = vpop.eup %1494 }
 0x209   : > { %v1497_v19 = vpop.eup %1496  ;;  %v889_v27 = vadd.f32 1.0, %v1495_v11  ;;  %1500 = vtanh.f32 %v885_v56 }
 0x20a   : > { %v890_v31 = vadd.f32 1.0, %v1497_v19 }
 0x20b   : > { %v892_v34 = vmul.f32 0.5, %v889_v27 }
 0x20c   : > { %v893_v28 = vmul.f32 0.5, %v890_v31  ;;  %v864_v10 = vpop.f32.mrf.mxu2  ;;  %v877_v18 = vpop.f32.mrf.mxu3 }
 0x20d   : > { %v1499_v5 = vpop.eup %1498 }
 0x20e   : > { %v896_v16 = vmul.f32 %v893_v28, %v816_v39  ;;  %v897_v32 = vmul.f32 %v1499_v5, %v892_v34 }
 0x20f   : > { %v1501_v37 = vpop.eup %1500 }
 0x210   : > { %v898_v42 = vadd.f32 %v897_v32, %v896_v16  ;;  %v891_v49 = vadd.f32 1.0, %v1501_v37 }
 0x212   : > { %1502 = vtanh.f32 %v898_v42  ;;  %v894_v50 = vmul.f32 0.5, %v891_v49 }
 0x218   : > { %v1503_v53 = vpop.eup %1502 }
 0x219   : > { %v900_v43 = vmul.f32 %v1503_v53, %v894_v50 }
 0x21b   : > { %v908_v44 = vpack.c.bf16 %v900_v43, %v900_v43 }
 0x21d   : > { %917 = vmatmul.bf16.vlgmr.msra.gmra.mxu0 %v908_v44  ;;  %930 = vmatmul.bf16.vlgmr.msra.gmra.mxu1 %v908_v44 }
 0x21e   : > { %943 = vmatmul.bf16.vlgmr.msra.gmra.mxu2 %v908_v44  ;;  %956 = vmatmul.bf16.vlgmr.msra.gmra.mxu3 %v908_v44 }
 0x29a   : > { %v918_v17 = vpop.f32.mrf.mxu0  ;;  %v931_v21 = vpop.f32.mrf.mxu1 }
 0x29b   : > { %v961_v26 = vadd.f32 %v918_v17, %v2030_v22  ;;  %v962_v35 = vadd.f32 %v931_v21, %v2031_v33 }
 0x29d   : > { %v965_v36 = vmul.f32 0.5, %v961_v26  ;;  %v966_v40 = vmul.f32 0.5, %v962_v35 }
 0x29f   : > { %1504 = vtanh.f32 %v965_v36 }
 0x2a0   : > { %1506 = vtanh.f32 %v966_v40 }
 0x2a1   : > { %v944_v46 = vpop.f32.mrf.mxu2  ;;  %v957_v47 = vpop.f32.mrf.mxu3 }
 0x2a2   : > { %v963_v48 = vadd.f32 %v944_v46, %v1921_v63  ;;  %v964_v58 = vadd.f32 %v957_v47, %v2032_v52  ;;  %v920_v60 = vpop.f32.mrf.mxu0  ;;  %v933_v61 = vpop.f32.mrf.mxu1 }
 0x2a4   : > { %v967_v1 = vmul.f32 0.5, %v963_v48  ;;  %1508 = vtanh.f32 %v964_v58 }
 0x2a5   : > { %v1505_v7 = vpop.eup %1504 }
 0x2a6   : > { %v1507_v8 = vpop.eup %1506  ;;  %v971_v9 = vadd.f32 1.0, %v1505_v7  ;;  %1510 = vtanh.f32 %v967_v1 }
 0x2a7   : > { %v972_v13 = vadd.f32 1.0, %v1507_v8 }
 0x2a8   : > { %v974_v20 = vmul.f32 0.5, %v971_v9 }
 0x2a9   : > { %v975_v23 = vmul.f32 0.5, %v972_v13  ;;  %v946_v24 = vpop.f32.mrf.mxu2  ;;  %v959_v29 = vpop.f32.mrf.mxu3 }
 0x2aa   : > { %v1509_v38 = vpop.eup %1508 }
 0x2ab   : > { %v978_v39 = vmul.f32 %v975_v23, %v898_v42  ;;  %v979_v41 = vmul.f32 %v1509_v38, %v974_v20 }
 0x2ac   : > { %v1511_v45 = vpop.eup %1510 }
 0x2ad   : > { %v980_v63 = vadd.f32 %v979_v41, %v978_v39  ;;  %v973_v55 = vadd.f32 1.0, %v1511_v45 }
 0x2af   : > { %1512 = vtanh.f32 %v980_v63  ;;  %984 = vst [vmem:[#allocation4] sm:$0xff] %v980_v63  ;;  %v976_v57 = vmul.f32 0.5, %v973_v55 }
 0x2b4   : > { %988 = sbr.rel (%p1344_p9) target bundleno = 1116 (0x45c), region = 60 }
 0x2b5   : > { %v1513_v59 = vpop.eup %1512 }
 0x2b6   : > { %v982_v62 = vmul.f32 %v1513_v59, %v976_v57 }
 0x2b8   : > { %983 = vst [vmem:[#allocation3] sm:$0xff] %v982_v62 }
 0x2b9   : > { %v1425_v12 = vld [vmem:[%s2020_s4 + $0x38] sm:$0xff]  ;;  %v1424_v15 = vld [vmem:[%s2020_s4 + $0x30] sm:$0xff]  ;;  %v1423_v25 = vld [vmem:[%s2020_s4 + $0x28] sm:$0xff]  ;;  %v989_v54 = vpack.c.bf16 %v982_v62, %v982_v62  ;;  %vm1071_vm1 = vcmask 31744  }
 0x2ba   : > { %1058 = vmatpush.bf16.msra.mxu0 %v1425_v12  ;;  %v1422_v30 = vld [vmem:[%s2020_s4 + $0x20] sm:$0xff]  ;;  %v1421_v14 = vld [vmem:[%s2020_s4 + $0x18] sm:$0xff]  ;;  %v1420_v51 = vld [vmem:[%s2020_s4 + $0x10] sm:$0xff] }
 0x2bb   : > { %v1419_v0 = vld [vmem:[%s2020_s4 + $0x8] sm:$0xff]  ;;  %v1418_v4 = vld [vmem:[%s2020_s4] sm:$0xff] }
 0x2bc   : > { %v1514_v2 = vld [vmem:[%s2021_s5] ss:$0 sm:$0xff] }
 0x2be   : > { %1059 = vmatpush.bf16.msra.mxu0 %v1424_v15 }
 0x2c2   : > { %1060 = vmatpush.bf16.msra.mxu0 %v1423_v25 }
 0x2c6   : > { %1061 = vmatpush.bf16.msra.mxu0 %v1422_v30 }
 0x2ca   : > { %1062 = vmatpush.bf16.msra.mxu0 %v1421_v14 }
 0x2ce   : > { %1063 = vmatpush.bf16.msra.mxu0 %v1420_v51 }
 0x2d2   : > { %1064 = vmatpush.bf16.msra.mxu0 %v1419_v0 }
 0x2d6   : > { %1065 = vmatpush.bf16.msra.mxu0 %v1418_v4 }
 0x2d9   : > { %1066 = vmatmul.bf16.vlgmr.msra.gmra.mxu0 %v989_v54 }
 0x356   : > { %v1067_v6 = vpop.f32.mrf.mxu0 }
 0x357   : > { %v1068_v3 = vadd.f32 %v1514_v2, %v1067_v6 }
 0x359   : > { %v1072_v56 = vsel %vm1071_vm1, %v1068_v3, -inf }
 0x35a   : > { %1073 = vmax.xlane.f32.xlu0 %v1072_v56 }
 0x35e   : > { %v1069_v11 = vpop.f32.mrf.mxu0 }
 0x3cd   : > { %v1074_v19 = vpop.xlane.xlu0 %1073 }
 0x3ce   : > { %v1075_v27 = vsub.f32 %v1068_v3, %v1074_v19 }
 0x3d0   : > { %v1076_v31 = vmul.f32 1.442695, %v1075_v27 }
 0x3d2   : > { %1515 = vpow2.f32 %v1076_v31 }
 0x3d8   : > { %v1516_v34 = vpop.eup %1515 }
 0x3d9   : > { %v1078_v28 = vsel %vm1071_vm1, %v1516_v34, 0.0 }
 0x3da   : > { %1079 = vadd.xlane.f32.xlu0 %v1078_v28 }
 0x44d   : > { %v1080_v10 = vpop.xlane.xlu0 %1079 }
 0x44e   : > { %1517 = vlog2.f32 %v1080_v10 }
 0x454   : > { %v1518_v18 = vpop.eup %1517 }
 0x455   : > { %v1082_v5 = vmul.f32 0.6931472, %v1518_v18 }
 0x457   : > { %v1083_v16 = vadd.f32 %v1082_v5, %v1074_v19 }
 0x459   : > { %v1084_v32 = vsub.f32 %v1068_v3, %v1083_v16 }
 0x45b   : > { %1085 = vst.msk [vmem:[%s2022_s6] sm:$0xff] %vm1071_vm1, %v1084_v32 }
 0x45c PF: > { %s18_s23 = sadd.s32 1, %s1609_s23   ;;  %s2033_s21 = smov %s1605_s22 }
 0x45d   : > { %p15_p10 = scmp.ge.s32.totalorder %s18_s23, 4   ;;  %s2034_s22 = smov %s2036_s25 }
 0x45f   :  { %17 = sbr.rel (!%p15_p10) target bundleno = 3 (0x3), region = 95 }
 0x464   :  { %1105 = vsyncpa [#allocation6], 1 }
 0x465   :  { %1107 = vsyncpa [#allocation6 + $0x1], 1 }
 0x466   :  { %1108 = vsyncpa [#allocation8], 1 }

</bundles_post_ra>
